<compile_context>
chip_gen: v7x
topology: tpu7x:2x2x1
jax: 0.10.0
libtpu: 0.0.40
codegen_flags: <defaults>
</compile_context>

<pallas_src>
import functools

import jax
import jax.numpy as jnp
from jax.experimental import pallas as pl
from jax.experimental.pallas import tpu as pltpu


def _round_up(x, m):
    return ((x + m - 1) // m) * m


def _gem_kernel(p_ref, x_ref, o_ref, acc_ref, *, eps, hw, thw, fold128, need_mask):
    k = pl.program_id(1)
    nk = pl.num_programs(1)

    @pl.when(k == 0)
    def _init():
        acc_ref[...] = jnp.zeros_like(acc_ref)

    p = p_ref[0]
    x = x_ref[...]
    if x.dtype != jnp.float32:
        x = x.astype(jnp.float32)
    # clamp(min=eps) guarantees positivity -> exp/log pow and log(mean) below
    # are well defined.
    xc = jnp.maximum(x, eps)

    def _fold(xp):
        # Reduce the spatial tile into the accumulator's shape.
        if fold128:
            # Lane-dense path: fold THW -> 128 lanes with plain VALU adds over
            # static, lane-aligned slices.  The cross-lane XLU reduce happens
            # once, in the finalize step.
            folded = xp[:, 0:128]
            for c in range(1, thw // 128):
                folded = folded + xp[:, c * 128:(c + 1) * 128]
            return folded
        return jnp.sum(xp, axis=-1, keepdims=True)

    def _add(xp):
        if need_mask:
            # Only the last spatial block can be partial (garbage lanes beyond
            # HW); mask only there so full blocks stay mask-free.
            is_partial = (k + 1) * thw > hw

            @pl.when(is_partial)
            def _masked():
                col = k * thw + jax.lax.broadcasted_iota(jnp.int32, xp.shape, 1)
                acc_ref[...] += _fold(jnp.where(col < hw, xp, 0.0))

            @pl.when(jnp.logical_not(is_partial))
            def _full():
                acc_ref[...] += _fold(xp)
        else:
            acc_ref[...] += _fold(xp)

    # Runtime dispatch on the learnable p.  Exact float compares: only exactly
    # integer p hits the VPU multiply paths; any drifted value takes the
    # general EUP exp/log path (correct, just slower).
    is_p1 = p == 1.0
    is_p2 = p == 2.0
    is_p3 = p == 3.0
    is_p4 = p == 4.0
    is_fast = is_p1 | is_p2 | is_p3 | is_p4

    @pl.when(is_p1)
    def _pow1():
        _add(xc)

    @pl.when(is_p2)
    def _pow2():
        _add(xc * xc)

    @pl.when(is_p3)
    def _pow3():
        _add(xc * xc * xc)

    @pl.when(is_p4)
    def _pow4():
        x2 = xc * xc
        _add(x2 * x2)

    @pl.when(jnp.logical_not(is_fast))
    def _pow_general():
        _add(jnp.exp(p * jnp.log(xc)))

    @pl.when(k == nk - 1)
    def _finalize():
        if fold128:
            s = jnp.sum(acc_ref[...], axis=-1, keepdims=True)
        else:
            s = acc_ref[...]
        m = s * (1.0 / hw)                    # mean over the true H*W extent
        y = jnp.exp(jnp.log(m) * (1.0 / p))   # m ** (1/p); m > 0 by eps clamp
        o_ref[...] = y.astype(o_ref.dtype)


def gem(x, p, eps=1e-6, *, hw_tile=4096, vmem_budget_bytes=12 * 1024 * 1024):
    """GeM pooling. x: (N, C, H, W), p: (1,). Returns (N, C, 1, 1)."""
    N, C, H, W = x.shape
    R = N * C
    HW = H * W

    x2 = x.reshape(R, HW)             # contiguous reshape: no extra HBM pass
    in_item = x2.dtype.itemsize
    out_item = in_item

    # --- spatial tiling -----------------------------------------------------
    hw_tile = max(128, (int(hw_tile) // 128) * 128)       # multiple of 128
    if HW <= hw_tile:
        THW = HW                       # full-extent block: any HW is legal
        need_mask = False
        fold128 = (HW % 128 == 0)
    else:
        THW = hw_tile                  # multiple of 128; partial last block OK
        need_mask = (HW % THW) != 0
        fold128 = True

    # --- row tiling: fill VMEM (~12 MiB total, incl. double buffers) ---------
    lanes = _round_up(THW, 128)        # VMEM lane-padded block width
    bytes_per_row = (2 * lanes * in_item        # double-buffered input block
                     + 2 * 128 * out_item       # double-buffered (TR,1) output
                     + 128 * 4)                 # f32 accumulator (lane-padded)
    tr_cap = max(8, (int(vmem_budget_bytes) // bytes_per_row) // 8 * 8)
    if R <= 8:
        TR = R                         # full-dim row block
    else:
        # Keep >= 2 steps on the parallel axis so v7x megacore can engage.
        TR = min(tr_cap, _round_up(pl.cdiv(R, 2), 8))

    grid = (pl.cdiv(R, TR), pl.cdiv(HW, THW))
    acc_lanes = 128 if fold128 else 1

    kernel = functools.partial(
        _gem_kernel,
        eps=float(eps),
        hw=int(HW),
        thw=int(THW),
        fold128=bool(fold128),
        need_mask=bool(need_mask),
    )

    p_s = p.reshape(1).astype(jnp.float32)

    cost = pl.CostEstimate(
        flops=5 * R * HW,
        transcendentals=2 * R * HW,          # worst case (general p path)
        bytes_accessed=R * HW * in_item + R * out_item + 4,
    )

    out = pl.pallas_call(
        kernel,
        out_shape=jax.ShapeDtypeStruct((R, 1), x.dtype),
        grid=grid,
        in_specs=[
            pl.BlockSpec(memory_space=pltpu.MemorySpace.SMEM),      # p scalar
            pl.BlockSpec((TR, THW), lambda i, k: (i, k)),           # x tile
        ],
        out_specs=pl.BlockSpec((TR, 1), lambda i, k: (i, 0)),
        scratch_shapes=[pltpu.VMEM((TR, acc_lanes), jnp.float32)],
        compiler_params=pltpu.CompilerParams(
            dimension_semantics=("parallel", "arbitrary")),
        cost_estimate=cost,
    )(p_s, x2)

    return out.reshape(N, C, 1, 1)


def _gem_ref(x, p, eps):
    return jnp.power(
        jnp.mean(jnp.power(jnp.maximum(x, eps), p[0]), axis=(2, 3), keepdims=True),
        1.0 / p[0],
    )


if __name__ == "__main__":
    k1, k2, k3 = jax.random.split(jax.random.PRNGKey(0), 3)
    eps = 1e-6

    # Case 1: default p = 3 (VPU fast path), HW lane-aligned, single step.
    N, C, H, W = 2, 4, 16, 16
    x = jax.random.normal(k1, (N, C, H, W), dtype=jnp.float32)
    p = jnp.ones((1,), dtype=jnp.float32) * 3.0       # nn.Parameter(ones(1)*3)
    y = gem(x, p, eps=eps)
    jax.block_until_ready(y)
    ref = _gem_ref(x, p, eps)
    assert y.shape == (N, C, 1, 1)
    assert jnp.allclose(y, ref, rtol=1e-4, atol=1e-5)

    # Case 2: non-integer p (EUP path) + ragged HW=49 (full-extent block, no
    # padding) + partial last row block (R=15, TR=8).
    N2, C2, H2, W2 = 3, 5, 7, 7
    x_b = jax.random.normal(k2, (N2, C2, H2, W2), dtype=jnp.float32)
    p_b = jnp.ones((1,), dtype=jnp.float32) * 2.5
    y_b = gem(x_b, p_b, eps=eps)
    jax.block_until_ready(y_b)
    ref_b = _gem_ref(x_b, p_b, eps)
    assert y_b.shape == (N2, C2, 1, 1)
    assert jnp.allclose(y_b, ref_b, rtol=1e-4, atol=1e-5)

    # Case 3: force spatial tiling (hw_tile=256, HW=324) -> partial last
    # spatial block with last-block-only masking, lane-dense accumulator,
    # p=2 fast path, 2-step parallel row axis.
    N3, C3, H3, W3 = 3, 4, 18, 18
    x_c = jax.random.normal(k3, (N3, C3, H3, W3), dtype=jnp.float32)
    p_c = jnp.ones((1,), dtype=jnp.float32) * 2.0
    y_c = gem(x_c, p_c, eps=eps, hw_tile=256)
    jax.block_until_ready(y_c)
    ref_c = _gem_ref(x_c, p_c, eps)
    assert y_c.shape == (N3, C3, 1, 1)
    assert jnp.allclose(y_c, ref_c, rtol=1e-4, atol=1e-5)

    print("KERNEL_OK")
</pallas_src>

<mosaic_0001>
module attributes {stable_mosaic.version = 11 : i64} {
  func.func @_gem_kernel(%arg0: i32, %arg1: i32, %arg2: memref<1xf32, #tpu.memory_space<smem>>, %arg3: memref<8x256xf32, #tpu.memory_space<vmem>>, %arg4: memref<8x1xf32, #tpu.memory_space<vmem>>, %arg5: memref<8x128xf32, #tpu.memory_space<vmem>>) attributes {dimension_semantics = [#tpu.dimension_semantics<parallel>, #tpu.dimension_semantics<arbitrary>], iteration_bounds = array<i64: 1, 1>, scalar_prefetch = 0 : i64, scratch_operands = 1 : i64, tpu.core_type = #tpu.core_type<tc>, window_params = [{transform_indices = @transform_0, window_bounds = array<i64: 1>}, {transform_indices = @transform_1, window_bounds = array<i64: 8, 256>}, {transform_indices = @transform_2, window_bounds = array<i64: 8, 1>}]} {
    %c0_i32 = arith.constant 0 : i32
    %0 = arith.cmpi eq, %arg1, %c0_i32 : i32
    %1 = arith.extui %0 : i1 to i32
    %c0_i32_0 = arith.constant 0 : i32
    %2 = arith.cmpi ne, %1, %c0_i32_0 : i32
    scf.if %2 {
      %cst_14 = arith.constant 0.000000e+00 : f32
      %28 = vector.broadcast %cst_14 : f32 to vector<8x128xf32>
      %c0_15 = arith.constant 0 : index
      %c0_16 = arith.constant 0 : index
      %29 = vector.load %arg5[%c0_15, %c0_16] : memref<8x128xf32, #tpu.memory_space<vmem>>, vector<8x128xf32>
      tpu.vector_store %arg5[%c0_15, %c0_16], %28 {strides = array<i32>} : memref<8x128xf32, #tpu.memory_space<vmem>>, vector<8x128xf32>,
    } else {
    }
    %c0 = arith.constant 0 : index
    %3 = memref.load %arg2[%c0] : memref<1xf32, #tpu.memory_space<smem>>
    %c0_1 = arith.constant 0 : index
    %c0_2 = arith.constant 0 : index
    %4 = vector.load %arg3[%c0_1, %c0_2] : memref<8x256xf32, #tpu.memory_space<vmem>>, vector<8x256xf32>
    %cst = arith.constant 9.99999997E-7 : f32
    %5 = vector.broadcast %cst : f32 to vector<8x256xf32>
    %6 = arith.maximumf %4, %5 : vector<8x256xf32>
    %cst_3 = arith.constant 1.000000e+00 : f32
    %7 = arith.cmpf oeq, %3, %cst_3 : f32
    %cst_4 = arith.constant 2.000000e+00 : f32
    %8 = arith.cmpf oeq, %3, %cst_4 : f32
    %cst_5 = arith.constant 3.000000e+00 : f32
    %9 = arith.cmpf oeq, %3, %cst_5 : f32
    %cst_6 = arith.constant 4.000000e+00 : f32
    %10 = arith.cmpf oeq, %3, %cst_6 : f32
    %11 = arith.ori %7, %8 : i1
    %12 = arith.ori %11, %9 : i1
    %13 = arith.ori %12, %10 : i1
    %14 = arith.extui %7 : i1 to i32
    %c0_i32_7 = arith.constant 0 : i32
    %15 = arith.cmpi ne, %14, %c0_i32_7 : i32
    scf.if %15 {
      %c0_14 = arith.constant 0 : index
      %c0_15 = arith.constant 0 : index
      %28 = vector.load %arg5[%c0_14, %c0_15] : memref<8x128xf32, #tpu.memory_space<vmem>>, vector<8x128xf32>
      %29 = vector.extract_strided_slice %6 {offsets = [0, 0], sizes = [8, 128], strides = [1, 1]} : vector<8x256xf32> to vector<8x128xf32>
      %30 = vector.extract_strided_slice %6 {offsets = [0, 128], sizes = [8, 128], strides = [1, 1]} : vector<8x256xf32> to vector<8x128xf32>
      %31 = arith.addf %29, %30 : vector<8x128xf32>
      %32 = arith.addf %28, %31 : vector<8x128xf32>
      %c0_16 = arith.constant 0 : index
      %c0_17 = arith.constant 0 : index
      %33 = vector.load %arg5[%c0_16, %c0_17] : memref<8x128xf32, #tpu.memory_space<vmem>>, vector<8x128xf32>
      tpu.vector_store %arg5[%c0_16, %c0_17], %32 {strides = array<i32>} : memref<8x128xf32, #tpu.memory_space<vmem>>, vector<8x128xf32>,
    } else {
    }
    %16 = arith.extui %8 : i1 to i32
    %c0_i32_8 = arith.constant 0 : i32
    %17 = arith.cmpi ne, %16, %c0_i32_8 : i32
    scf.if %17 {
      %28 = arith.mulf %6, %6 : vector<8x256xf32>
      %c0_14 = arith.constant 0 : index
      %c0_15 = arith.constant 0 : index
      %29 = vector.load %arg5[%c0_14, %c0_15] : memref<8x128xf32, #tpu.memory_space<vmem>>, vector<8x128xf32>
      %30 = vector.extract_strided_slice %28 {offsets = [0, 0], sizes = [8, 128], strides = [1, 1]} : vector<8x256xf32> to vector<8x128xf32>
      %31 = vector.extract_strided_slice %28 {offsets = [0, 128], sizes = [8, 128], strides = [1, 1]} : vector<8x256xf32> to vector<8x128xf32>
      %32 = arith.addf %30, %31 : vector<8x128xf32>
      %33 = arith.addf %29, %32 : vector<8x128xf32>
      %c0_16 = arith.constant 0 : index
      %c0_17 = arith.constant 0 : index
      %34 = vector.load %arg5[%c0_16, %c0_17] : memref<8x128xf32, #tpu.memory_space<vmem>>, vector<8x128xf32>
      tpu.vector_store %arg5[%c0_16, %c0_17], %33 {strides = array<i32>} : memref<8x128xf32, #tpu.memory_space<vmem>>, vector<8x128xf32>,
    } else {
    }
    %18 = arith.extui %9 : i1 to i32
    %c0_i32_9 = arith.constant 0 : i32
    %19 = arith.cmpi ne, %18, %c0_i32_9 : i32
    scf.if %19 {
      %28 = arith.mulf %6, %6 : vector<8x256xf32>
      %29 = arith.mulf %28, %6 : vector<8x256xf32>
      %c0_14 = arith.constant 0 : index
      %c0_15 = arith.constant 0 : index
      %30 = vector.load %arg5[%c0_14, %c0_15] : memref<8x128xf32, #tpu.memory_space<vmem>>, vector<8x128xf32>
      %31 = vector.extract_strided_slice %29 {offsets = [0, 0], sizes = [8, 128], strides = [1, 1]} : vector<8x256xf32> to vector<8x128xf32>
      %32 = vector.extract_strided_slice %29 {offsets = [0, 128], sizes = [8, 128], strides = [1, 1]} : vector<8x256xf32> to vector<8x128xf32>
      %33 = arith.addf %31, %32 : vector<8x128xf32>
      %34 = arith.addf %30, %33 : vector<8x128xf32>
      %c0_16 = arith.constant 0 : index
      %c0_17 = arith.constant 0 : index
      %35 = vector.load %arg5[%c0_16, %c0_17] : memref<8x128xf32, #tpu.memory_space<vmem>>, vector<8x128xf32>
      tpu.vector_store %arg5[%c0_16, %c0_17], %34 {strides = array<i32>} : memref<8x128xf32, #tpu.memory_space<vmem>>, vector<8x128xf32>,
    } else {
    }
    %20 = arith.extui %10 : i1 to i32
    %c0_i32_10 = arith.constant 0 : i32
    %21 = arith.cmpi ne, %20, %c0_i32_10 : i32
    scf.if %21 {
      %28 = arith.mulf %6, %6 : vector<8x256xf32>
      %29 = arith.mulf %28, %28 : vector<8x256xf32>
      %c0_14 = arith.constant 0 : index
      %c0_15 = arith.constant 0 : index
      %30 = vector.load %arg5[%c0_14, %c0_15] : memref<8x128xf32, #tpu.memory_space<vmem>>, vector<8x128xf32>
      %31 = vector.extract_strided_slice %29 {offsets = [0, 0], sizes = [8, 128], strides = [1, 1]} : vector<8x256xf32> to vector<8x128xf32>
      %32 = vector.extract_strided_slice %29 {offsets = [0, 128], sizes = [8, 128], strides = [1, 1]} : vector<8x256xf32> to vector<8x128xf32>
      %33 = arith.addf %31, %32 : vector<8x128xf32>
      %34 = arith.addf %30, %33 : vector<8x128xf32>
      %c0_16 = arith.constant 0 : index
      %c0_17 = arith.constant 0 : index
      %35 = vector.load %arg5[%c0_16, %c0_17] : memref<8x128xf32, #tpu.memory_space<vmem>>, vector<8x128xf32>
      tpu.vector_store %arg5[%c0_16, %c0_17], %34 {strides = array<i32>} : memref<8x128xf32, #tpu.memory_space<vmem>>, vector<8x128xf32>,
    } else {
    }
    %true = arith.constant true
    %22 = arith.xori %13, %true : i1
    %23 = arith.extui %22 : i1 to i32
    %c0_i32_11 = arith.constant 0 : i32
    %24 = arith.cmpi ne, %23, %c0_i32_11 : i32
    scf.if %24 {
      %28 = math.log %6 : vector<8x256xf32>
      %29 = vector.broadcast %3 : f32 to vector<8x256xf32>
      %30 = arith.mulf %29, %28 : vector<8x256xf32>
      %31 = math.exp %30 : vector<8x256xf32>
      %c0_14 = arith.constant 0 : index
      %c0_15 = arith.constant 0 : index
      %32 = vector.load %arg5[%c0_14, %c0_15] : memref<8x128xf32, #tpu.memory_space<vmem>>, vector<8x128xf32>
      %33 = vector.extract_strided_slice %31 {offsets = [0, 0], sizes = [8, 128], strides = [1, 1]} : vector<8x256xf32> to vector<8x128xf32>
      %34 = vector.extract_strided_slice %31 {offsets = [0, 128], sizes = [8, 128], strides = [1, 1]} : vector<8x256xf32> to vector<8x128xf32>
      %35 = arith.addf %33, %34 : vector<8x128xf32>
      %36 = arith.addf %32, %35 : vector<8x128xf32>
      %c0_16 = arith.constant 0 : index
      %c0_17 = arith.constant 0 : index
      %37 = vector.load %arg5[%c0_16, %c0_17] : memref<8x128xf32, #tpu.memory_space<vmem>>, vector<8x128xf32>
      tpu.vector_store %arg5[%c0_16, %c0_17], %36 {strides = array<i32>} : memref<8x128xf32, #tpu.memory_space<vmem>>, vector<8x128xf32>,
    } else {
    }
    %c0_i32_12 = arith.constant 0 : i32
    %25 = arith.cmpi eq, %arg1, %c0_i32_12 : i32
    %26 = arith.extui %25 : i1 to i32
    %c0_i32_13 = arith.constant 0 : i32
    %27 = arith.cmpi ne, %26, %c0_i32_13 : i32
    scf.if %27 {
      %c0_14 = arith.constant 0 : index
      %c0_15 = arith.constant 0 : index
      %28 = vector.load %arg5[%c0_14, %c0_15] : memref<8x128xf32, #tpu.memory_space<vmem>>, vector<8x128xf32>
      %cst_16 = arith.constant dense<0.000000e+00> : vector<8xf32>
      %29 = vector.multi_reduction <add>, %28, %cst_16 [1] : vector<8x128xf32> to vector<8xf32>
      %30 = vector.shape_cast %29 : vector<8xf32> to vector<8x1xf32>
      %cst_17 = arith.constant 3.906250e-03 : f32
      %31 = vector.broadcast %cst_17 : f32 to vector<8x1xf32>
      %32 = arith.mulf %30, %31 : vector<8x1xf32>
      %33 = math.log %32 : vector<8x1xf32>
      %cst_18 = arith.constant 1.000000e+00 : f32
      %34 = arith.divf %cst_18, %3 : f32
      %35 = vector.broadcast %34 : f32 to vector<8x1xf32>
      %36 = arith.mulf %33, %35 : vector<8x1xf32>
      %37 = math.exp %36 : vector<8x1xf32>
      %c0_19 = arith.constant 0 : index
      %c0_20 = arith.constant 0 : index
      %38 = vector.load %arg4[%c0_19, %c0_20] : memref<8x1xf32, #tpu.memory_space<vmem>>, vector<8x1xf32>
      tpu.vector_store %arg4[%c0_19, %c0_20], %37 {strides = array<i32>} : memref<8x1xf32, #tpu.memory_space<vmem>>, vector<8x1xf32>,
    } else {
    }
    return
  }
  func.func @transform_0(%arg0: i32, %arg1: i32) -> i32 {
    %c0_i32 = arith.constant 0 : i32
    %c0_i32_0 = arith.constant 0 : i32
    return %c0_i32 : i32
  }
  func.func @transform_1(%arg0: i32, %arg1: i32) -> (i32, i32) {
    %c0_i32 = arith.constant 0 : i32
    return %arg0, %arg1 : i32, i32
  }
  func.func @transform_2(%arg0: i32, %arg1: i32) -> (i32, i32) {
    %c0_i32 = arith.constant 0 : i32
    %c0_i32_0 = arith.constant 0 : i32
    return %arg0, %c0_i32 : i32, i32
  }
}

</mosaic_0001>

<bundles_post_ra>
// kernel: tpu_custom_call.1
= control target key start
LH: loop header
LB: loop body
LE: loop exit
PB: predicated region body
PF: predicated region fallthrough
CT: control target
= control target key end

     0   :  { %8 = vsyncpa [#allocation5], 0  ;;  %s162_s9 = smov [#allocation4]   ;;  %s242_s0 = inlined_call_operand.<no memory space> [shape: f32[1], index: 0, kind: input, shape index: {}]   ;;  %s243_s1 = inlined_call_operand.hbm [shape: f32[8,256], index: 1, kind: input, shape index: {}]   ;;  %s244_s2 = inlined_call_operand.vmem [shape: f32[8,1], index: 2, kind: output, shape index: {}]  }
   0x1   :  { %s17_s10 = sshll.u32 %s162_s9, 4  ;;  %s138_s13 = scalar_lea.hbm %s243_s1, 256  ;;  %s18_s10 = int_to_ptr.vmem [resolvable:$true] %s17_s10 }
   0x2   :  { %p139_p0 = scmp.ne.s32.totalorder %s243_s1, %s138_s13  ;;  %p142_p1 = scmp.lt.u32.totalorder %s138_s13, %s243_s1 }
   0x4   :  { %p144_p2 = pnand %p142_p1, %p139_p0 }
   0x6   :  { %147 = shalt.err (!%p144_p2)
}
   0x7   :  { %s148_s18 = scalar_lea.vmem %s18_s10, 256  ;;  %p153_p4 = scmp.lt.s32.totalorder %s18_s10, %s18_s10 }
   0x8   :  { %p149_p3 = scmp.ne.s32.totalorder %s18_s10, %s148_s18  ;;  %p154_p5 = scmp.lt.s32.totalorder %s148_s18, %s148_s18 }
   0xa   :  { %p155_p6 = por %p154_p5, %p153_p4 }
   0xc   :  { %p156_p7 = pnand %p155_p6, %p149_p3 }
   0xe   :  { %159 = shalt.err (!%p156_p7)
}
   0xf   :  { %20 = dma.hbm_to_vmem [thread:$0]  %s243_s1, 256, %s18_s10, [#allocation5]  }
  0x10   :  { %160 = dma.done.wait [#allocation5], 256  }
  0x11   :  { %161 = vsyncadd [#allocation5], 4294967040  ;;  %p34_p8 = scmp.eq.f32.partialorder %s242_s0, 1.0  ;;  %p35_p9 = scmp.eq.f32.partialorder %s242_s0, 2.0  ;;  %v163_v0 = vmov 0.0   ;;  %v30_v1 = vld [vmem:[#allocation4] sm:$0xff] }
  0x12   :  { %28 = vst [vmem:[#allocation2] sm:$0xff] %v163_v0  ;;  %p36_p10 = scmp.eq.f32.partialorder %s242_s0, 3.0  ;;  %p37_p11 = scmp.eq.f32.partialorder %s242_s0, 4.0  ;;  %v31_v2 = vld [vmem:[#allocation4 + $0x8] sm:$0xff]  ;;  %v32_v3 = vmax.f32 %v30_v1, 1e-06 }
  0x13   :  { %p38_p12 = por %p35_p9, %p34_p8  ;;  %v33_v4 = vmax.f32 %v31_v2, 1e-06  ;;  %43 = sbr.rel (!%p34_p8) target bundleno = 29 (0x1d), region = 21 }
  0x15   :  { %p39_p13 = por %p38_p12, %p36_p10  ;;  %v45_v6 = vadd.f32 (%p34_p8), %v33_v4, %v32_v3 }
  0x17   :  { %p215_p0 = por %p39_p13, %p37_p11 }
  0x19   :  { %v44_v5 = vld [vmem:[#allocation2] sm:$0xff] (%p34_p8) }
  0x1a   :  { %v46_v7 = vadd.f32 %v45_v6, %v44_v5 }
  0x1c   :  { %47 = vst [vmem:[#allocation2] sm:$0xff] %v46_v7 }
  0x1d PF:  { %50 = sbr.rel (!%p35_p9) target bundleno = 39 (0x27), region = 25  ;;  %v51_v8 = vmul.f32 (%p35_p9), %v32_v3, %v32_v3  ;;  %v52_v9 = vmul.f32 (%p35_p9), %v33_v4, %v33_v4 }
  0x1f   :  { %v54_v11 = vadd.f32 (%p35_p9), %v52_v9, %v51_v8 }
  0x23   :  { %v53_v10 = vld [vmem:[#allocation2] sm:$0xff] (%p35_p9) }
  0x24   :  { %v55_v12 = vadd.f32 %v54_v11, %v53_v10 }
  0x26   :  { %56 = vst [vmem:[#allocation2] sm:$0xff] %v55_v12 }
  0x27 PF:  { %59 = sbr.rel (!%p36_p10) target bundleno = 49 (0x31), region = 29  ;;  %v60_v13 = vmul.f32 (%p36_p10), %v32_v3, %v32_v3  ;;  %v61_v14 = vmul.f32 (%p36_p10), %v33_v4, %v33_v4 }
  0x29   :  { %v62_v15 = vmul.f32 (%p36_p10), %v60_v13, %v32_v3  ;;  %v63_v16 = vmul.f32 (%p36_p10), %v61_v14, %v33_v4 }
  0x2b   :  { %v65_v18 = vadd.f32 (%p36_p10), %v63_v16, %v62_v15 }
  0x2d   :  { %v64_v17 = vld [vmem:[#allocation2] sm:$0xff] (%p36_p10) }
  0x2e   :  { %v66_v19 = vadd.f32 %v65_v18, %v64_v17 }
  0x30   :  { %67 = vst [vmem:[#allocation2] sm:$0xff] %v66_v19 }
  0x31 PF:  { %70 = sbr.rel (!%p37_p11) target bundleno = 59 (0x3b), region = 33  ;;  %v71_v20 = vmul.f32 (%p37_p11), %v32_v3, %v32_v3  ;;  %v72_v21 = vmul.f32 (%p37_p11), %v33_v4, %v33_v4 }
  0x33   :  { %v73_v22 = vmul.f32 (%p37_p11), %v71_v20, %v71_v20  ;;  %v74_v23 = vmul.f32 (%p37_p11), %v72_v21, %v72_v21 }
  0x35   :  { %v76_v25 = vadd.f32 (%p37_p11), %v74_v23, %v73_v22 }
  0x37   :  { %v75_v24 = vld [vmem:[#allocation2] sm:$0xff] (%p37_p11) }
  0x38   :  { %v77_v26 = vadd.f32 %v76_v25, %v75_v24 }
  0x3a   :  { %78 = vst [vmem:[#allocation2] sm:$0xff] %v77_v26 }
  0x3b PF:  { %81 = sbr.rel (%p215_p0) target bundleno = 93 (0x5d), region = 37  ;;  %124 = vlog2.f32 (!%p215_p0), %v32_v3  ;;  %v86_v28 = vstv (!%p215_p0), %s242_s0 }
  0x3c   :  { %126 = vlog2.f32 (!%p215_p0), %v33_v4 }
  0x41   :  { %v93_v38 = vld [vmem:[#allocation2] sm:$0xff] (!%p215_p0) }
  0x45   :  { %v125_v27 = vpop.eup %124 }
  0x46   :  { %v127_v29 = vpop.eup %126  ;;  %v83_v30 = vmul.f32 0.6931472, %v125_v27 }
  0x47   :  { %v85_v31 = vmul.f32 0.6931472, %v127_v29 }
  0x48   :  { %v87_v32 = vmul.f32 %v86_v28, %v83_v30 }
  0x49   :  { %v88_v33 = vmul.f32 %v86_v28, %v85_v31 }
  0x4a   :  { %v89_v34 = vmul.f32 1.442695, %v87_v32 }
  0x4b   :  { %v91_v35 = vmul.f32 1.442695, %v88_v33 }
  0x4c   :  { %128 = vpow2.f32 %v89_v34 }
  0x4d   :  { %130 = vpow2.f32 %v91_v35 }
  0x56   :  { %v129_v36 = vpop.eup %128 }
  0x57   :  { %v131_v37 = vpop.eup %130 }
  0x58   :  { %v94_v39 = vadd.f32 %v131_v37, %v129_v36 }
  0x5a   :  { %v95_v40 = vadd.f32 %v94_v39, %v93_v38 }
  0x5c   :  { %96 = vst [vmem:[#allocation2] sm:$0xff] %v95_v40 }
  0x5d PF:  { %v106_v42 = vstv %s242_s0  ;;  %vm113_vm0 = vcmask 7168  }
  0x5e   :  { %132 = vrcp.f32 %v106_v42 }
  0x63   :  { %v100_v41 = vld [vmem:[#allocation2] sm:$0xff] }
  0x64   :  { %101 = vadd.xlane.f32.xlu0 %v100_v41 }
  0x68   :  { %v133_v43 = vpop.eup %132 }
  0x69   :  { %120 = vpush %v133_v43 }
  0x9a   :  { %s121_s17 = spop %120 }
  0x9b   :  { %v109_v47 = vstv %s121_s17 }
  0xf1   :  { %v102_v44 = vpop.xlane.xlu0 %101 }
  0xf2   :  { %v103_v45 = vmul.f32 0.00390625, %v102_v44 }
  0xf4   :  { %134 = vlog2.f32 %v103_v45 }
  0xfe   :  { %v135_v46 = vpop.eup %134 }
  0xff   :  { %v105_v48 = vmul.f32 0.6931472, %v135_v46 }
 0x101   :  { %v110_v49 = vmul.f32 %v109_v47, %v105_v48 }
 0x103   :  { %v111_v50 = vmul.f32 1.442695, %v110_v49 }
 0x105   :  { %136 = vpow2.f32 %v111_v50 }
 0x10f   :  { %v137_v51 = vpop.eup %136 }
 0x110   :  { %114 = vst.msk [vmem:[%s244_s2] sm:$0xff] %vm113_vm0, %v137_v51 }
 0x111   :  { %119 = vsyncpa [#allocation5], 1 }

</bundles_post_ra>
